<compile_context>
chip_gen: v5e
topology: v5e:2x2
jax: 0.10.0
libtpu: 0.0.40
codegen_flags: <defaults>
</compile_context>

<pallas_src>
import jax
import jax.numpy as jnp
from jax import lax
from jax.experimental import pallas as pl
from jax.experimental.pallas import tpu as pltpu

_EPS = 1e-5
_LANE = 128
_SUBLANE = 8
_MAX_TILE_ROWS = 4096


def _round_up(x: int, m: int) -> int:
    return ((x + m - 1) // m) * m


def _vmem_budgets():
    """Returns (per-tile working-set budget, vmem_limit_bytes), generation aware."""
    cap = None
    try:
        info = pltpu.get_tpu_info()
        cap = getattr(info, "vmem_capacity_bytes", None)
    except Exception:
        cap = None
    if cap is None:
        cap = 64 * 1024 * 1024                       # conservative (v7x-sized) default
    if cap >= 100 * 1024 * 1024:                      # v5e / v6e: 128 MiB physical VMEM
        return 24 * 1024 * 1024, 64 * 1024 * 1024
    return 14 * 1024 * 1024, 30 * 1024 * 1024         # v7x: 64 MiB physical / 32 MiB scoped


def classifier_discrepancy_loss(out1, out2, balance: bool = True):
    """Pallas implementation of ClassifierDiscrepancyLoss.forward (scalar loss)."""
    assert out1.shape == out2.shape and out1.ndim == 2
    n, c = out1.shape
    itemsize = jnp.dtype(out1.dtype).itemsize
    f32 = jnp.float32

    # ---- lane-dense packing only when it is free (no pad/copy needed) --------
    if c < _LANE and _LANE % c == 0 and n % (_LANE // c) == 0:
        pack = _LANE // c            # metadata-only reshape (N, C) -> (N/pack, pack*C)
    else:
        pack = 1                     # block last dim = full C; Mosaic lane-pads in VMEM
    w = pack * c
    rows = n // pack

    # ---- tile / grid sizing ---------------------------------------------------
    # Budget covers 2 inputs x 2 DMA buffers (HBM dtype) plus ~6 tile-sized f32
    # temporaries (o1, o2 casts, two logs, products).  Lane width is the VMEM-
    # padded width for sizing purposes.
    tile_budget, vmem_limit = _vmem_budgets()
    w_pad = _round_up(w, _LANE)
    per_row_bytes = w_pad * (4 * itemsize + 6 * 4)
    cap = min(_MAX_TILE_ROWS, max(_SUBLANE, tile_budget // per_row_bytes))
    cap = (cap // _SUBLANE) * _SUBLANE

    if rows <= cap:
        tile_r = rows                # single full block (full-dim block is always legal)
        n_tiles = 1
    else:
        tile_r = cap                 # multiple of 8
        n_tiles = -(-rows // tile_r)

    rem = rows - (n_tiles - 1) * tile_r      # valid rows in the last tile
    has_partial = rem < tile_r

    splits = 2 if n_tiles >= 2 else 1        # one partial block per TensorCore (v7x)
    tiles_per_split = -(-n_tiles // splits)
    grid_tiles = splits * tiles_per_split    # >= n_tiles; ghost tiles are skipped

    # Sublane-wide accumulation (defers the 8->1 XLU collapse to the epilogue)
    # whenever the tile layout allows it.
    grouped = (tile_r % _SUBLANE == 0) and (w % _LANE == 0)
    sub = _SUBLANE if grouped else 1

    def _colsum(x):
        if grouped:
            return x.reshape(-1, _SUBLANE, w).sum(axis=0)    # (8, W) VALU-only adds
        return x.sum(axis=0, keepdims=True)                  # (1, W)

    def kernel(o1_ref, o2_ref, cross_ref, *bal_refs):
        s = pl.program_id(0)
        t = pl.program_id(1)
        gi = s * tiles_per_split + t

        @pl.when(t == 0)
        def _init():
            cross_ref[...] = jnp.zeros_like(cross_ref)
            for r in bal_refs:
                r[...] = jnp.zeros_like(r)

        def _accumulate(o1, o2):
            l1 = jnp.log(o1 + _EPS)
            l2 = jnp.log(o2 + _EPS)
            # Sign is folded into the epilogue: accumulate +(o1*l2 + o2*l1).
            cross_ref[0] += _colsum(o1 * l2 + o2 * l1)
            if bal_refs:
                bal_refs[0][0] += _colsum(o1)
                bal_refs[1][0] += _colsum(o2)

        need_guard = has_partial or (grid_tiles > n_tiles)
        if not need_guard:
            _accumulate(o1_ref[...].astype(f32), o2_ref[...].astype(f32))
        else:
            last = n_tiles - 1
            full_cond = (gi < last) if has_partial else (gi < n_tiles)

            @pl.when(full_cond)
            def _full():
                _accumulate(o1_ref[...].astype(f32), o2_ref[...].astype(f32))

            if has_partial:
                @pl.when(gi == last)
                def _partial():
                    # Rows past n in the partial block hold undefined VMEM data:
                    # mask them to 0 (neutral: -0*log(0+eps) == 0, column sum += 0).
                    rid = lax.broadcasted_iota(jnp.int32, (tile_r, w), 0)
                    valid = rid < rem
                    o1 = jnp.where(valid, o1_ref[...].astype(f32), 0.0)
                    o2 = jnp.where(valid, o2_ref[...].astype(f32), 0.0)
                    _accumulate(o1, o2)
            # gi >= n_tiles (ghost tile from an uneven split): do nothing.

    # Metadata-only views; NO jnp.pad HBM copies.
    v1 = out1.reshape(rows, w) if pack > 1 else out1
    v2 = out2.reshape(rows, w) if pack > 1 else out2

    in_spec = pl.BlockSpec(
        (tile_r, w),
        lambda s, t: (jnp.minimum(s * tiles_per_split + t, n_tiles - 1), 0),
    )
    part_spec = pl.BlockSpec((1, sub, w), lambda s, t: (s, 0, 0))
    part_shape = jax.ShapeDtypeStruct((splits, sub, w), f32)
    n_out = 3 if balance else 1

    outs = pl.pallas_call(
        kernel,
        out_shape=tuple([part_shape] * n_out),
        grid_spec=pltpu.PrefetchScalarGridSpec(
            num_scalar_prefetch=0,
            grid=(splits, tiles_per_split),
            in_specs=[in_spec, in_spec],
            out_specs=tuple([part_spec] * n_out),
        ),
        compiler_params=pltpu.CompilerParams(
            dimension_semantics=("parallel", "arbitrary"),
            vmem_limit_bytes=vmem_limit,
        ),
    )(v1, v2)

    # ---- tiny epilogue on O(splits*8*W + C) elements ---------------------------
    loss = -jnp.sum(outs[0]) / n
    if balance:
        col1 = jnp.sum(outs[1], axis=(0, 1))        # (W,)
        col2 = jnp.sum(outs[2], axis=(0, 1))
        if pack > 1:
            # packed lane j holds class j % C
            col1 = col1.reshape(pack, c).sum(axis=0)
            col2 = col2.reshape(pack, c).sum(axis=0)
        m1 = col1 / n
        m2 = col2 / n
        loss = loss + jnp.sum(m1 * jnp.log(m1 + _EPS))
        loss = loss + jnp.sum(m2 * jnp.log(m2 + _EPS))
    return loss


def _reference_loss(out1, out2, balance: bool = True):
    # Plain-JAX reference mirroring the PyTorch forward, for verification.
    o1 = out1.astype(jnp.float32)
    o2 = out2.astype(jnp.float32)
    loss = jnp.mean(
        jnp.sum(-o1 * jnp.log(o2 + _EPS), axis=1)
        + jnp.sum(-o2 * jnp.log(o1 + _EPS), axis=1)
    )
    if balance:
        m1 = jnp.mean(o1, axis=0)
        m2 = jnp.mean(o2, axis=0)
        loss = loss + jnp.sum(m1 * jnp.log(m1 + _EPS))
        loss = loss + jnp.sum(m2 * jnp.log(m2 + _EPS))
    return loss


if __name__ == "__main__":
    key = jax.random.PRNGKey(0)

    def make(k, shape, dtype=jnp.float32):
        # Module expects probability-like inputs (softmaxed classifier outputs).
        k1, k2 = jax.random.split(k)
        a = jax.nn.softmax(jax.random.normal(k1, shape, jnp.float32), axis=1)
        b = jax.nn.softmax(jax.random.normal(k2, shape, jnp.float32), axis=1)
        return a.astype(dtype), b.astype(dtype)

    # Primary small case consistent with the module: batch=8, classes=32.
    o1, o2 = make(key, (8, 32))
    loss = jax.block_until_ready(classifier_discrepancy_loss(o1, o2, balance=True))
    ref = _reference_loss(o1, o2, balance=True)
    assert jnp.allclose(loss, ref, rtol=1e-5, atol=1e-5), (loss, ref)

    # Extra coverage of the different layout / tiling / masking / split paths.
    checks = [
        ((8, 32), False, jnp.float32, 1e-5),      # balance disabled (single output)
        ((300, 10), True, jnp.float32, 1e-4),     # C not a divisor of 128 -> full-C block
        ((6000, 32), True, jnp.float32, 1e-3),    # packed, single large tile
        ((20000, 32), True, jnp.float32, 1e-3),   # multi-tile + splits + masked last tile
        ((4096, 256), True, jnp.bfloat16, 1e-3),  # C >= 128, bf16 inputs, partial last tile
    ]
    for i, (shape, bal, dtype, tol) in enumerate(checks):
        k = jax.random.fold_in(key, i)
        a, b = make(k, shape, dtype)
        got = jax.block_until_ready(classifier_discrepancy_loss(a, b, balance=bal))
        want = _reference_loss(a, b, balance=bal)
        assert jnp.allclose(got, want, rtol=tol, atol=tol), (shape, bal, dtype, got, want)

    print("KERNEL_OK")
</pallas_src>

<mosaic_0001>
module attributes {stable_mosaic.version = 11 : i64} {
  func.func @kernel(%arg0: i32, %arg1: i32, %arg2: memref<2x128xf32, #tpu.memory_space<vmem>>, %arg3: memref<2x128xf32, #tpu.memory_space<vmem>>, %arg4: memref<1x1x128xf32, #tpu.memory_space<vmem>>, %arg5: memref<1x1x128xf32, #tpu.memory_space<vmem>>, %arg6: memref<1x1x128xf32, #tpu.memory_space<vmem>>) attributes {dimension_semantics = [#tpu.dimension_semantics<parallel>, #tpu.dimension_semantics<arbitrary>], iteration_bounds = array<i64: 1, 1>, scalar_prefetch = 0 : i64, scratch_operands = 0 : i64, tpu.core_type = #tpu.core_type<tc>, window_params = [{transform_indices = @transform_0, window_bounds = array<i64: 2, 128>}, {transform_indices = @transform_1, window_bounds = array<i64: 2, 128>}, {transform_indices = @transform_2, window_bounds = array<i64: 1, 1, 128>}, {transform_indices = @transform_3, window_bounds = array<i64: 1, 1, 128>}, {transform_indices = @transform_4, window_bounds = array<i64: 1, 1, 128>}]} {
    %c0_i32 = arith.constant 0 : i32
    %0 = arith.cmpi eq, %arg1, %c0_i32 : i32
    %1 = arith.extui %0 : i1 to i32
    %c0_i32_0 = arith.constant 0 : i32
    %2 = arith.cmpi ne, %1, %c0_i32_0 : i32
    scf.if %2 {
      %cst_26 = arith.constant 0.000000e+00 : f32
      %38 = vector.broadcast %cst_26 : f32 to vector<1x1x128xf32>
      %c0_27 = arith.constant 0 : index
      %c0_28 = arith.constant 0 : index
      %c0_29 = arith.constant 0 : index
      %39 = vector.load %arg4[%c0_27, %c0_28, %c0_29] : memref<1x1x128xf32, #tpu.memory_space<vmem>>, vector<1x1x128xf32>
      tpu.vector_store %arg4[%c0_27, %c0_28, %c0_29], %38 {strides = array<i32>} : memref<1x1x128xf32, #tpu.memory_space<vmem>>, vector<1x1x128xf32>,
      %cst_30 = arith.constant 0.000000e+00 : f32
      %40 = vector.broadcast %cst_30 : f32 to vector<1x1x128xf32>
      %c0_31 = arith.constant 0 : index
      %c0_32 = arith.constant 0 : index
      %c0_33 = arith.constant 0 : index
      %41 = vector.load %arg5[%c0_31, %c0_32, %c0_33] : memref<1x1x128xf32, #tpu.memory_space<vmem>>, vector<1x1x128xf32>
      tpu.vector_store %arg5[%c0_31, %c0_32, %c0_33], %40 {strides = array<i32>} : memref<1x1x128xf32, #tpu.memory_space<vmem>>, vector<1x1x128xf32>,
      %cst_34 = arith.constant 0.000000e+00 : f32
      %42 = vector.broadcast %cst_34 : f32 to vector<1x1x128xf32>
      %c0_35 = arith.constant 0 : index
      %c0_36 = arith.constant 0 : index
      %c0_37 = arith.constant 0 : index
      %43 = vector.load %arg6[%c0_35, %c0_36, %c0_37] : memref<1x1x128xf32, #tpu.memory_space<vmem>>, vector<1x1x128xf32>
      tpu.vector_store %arg6[%c0_35, %c0_36, %c0_37], %42 {strides = array<i32>} : memref<1x1x128xf32, #tpu.memory_space<vmem>>, vector<1x1x128xf32>,
    } else {
    }
    %c0 = arith.constant 0 : index
    %c0_1 = arith.constant 0 : index
    %3 = vector.load %arg2[%c0, %c0_1] : memref<2x128xf32, #tpu.memory_space<vmem>>, vector<2x128xf32>
    %c0_2 = arith.constant 0 : index
    %c0_3 = arith.constant 0 : index
    %4 = vector.load %arg3[%c0_2, %c0_3] : memref<2x128xf32, #tpu.memory_space<vmem>>, vector<2x128xf32>
    %cst = arith.constant 9.99999974E-6 : f32
    %5 = vector.broadcast %cst : f32 to vector<2x128xf32>
    %6 = arith.addf %3, %5 : vector<2x128xf32>
    %7 = math.log %6 : vector<2x128xf32>
    %cst_4 = arith.constant 9.99999974E-6 : f32
    %8 = vector.broadcast %cst_4 : f32 to vector<2x128xf32>
    %9 = arith.addf %4, %8 : vector<2x128xf32>
    %10 = math.log %9 : vector<2x128xf32>
    %c0_5 = arith.constant 0 : index
    %c0_6 = arith.constant 0 : index
    %c0_7 = arith.constant 0 : index
    %11 = vector.load %arg4[%c0_5, %c0_6, %c0_7] : memref<1x1x128xf32, #tpu.memory_space<vmem>>, vector<1x1x128xf32>
    %12 = vector.shape_cast %11 : vector<1x1x128xf32> to vector<1x128xf32>
    %13 = arith.mulf %3, %10 : vector<2x128xf32>
    %14 = arith.mulf %4, %7 : vector<2x128xf32>
    %15 = arith.addf %13, %14 : vector<2x128xf32>
    %cst_8 = arith.constant dense<0.000000e+00> : vector<128xf32>
    %16 = vector.multi_reduction <add>, %15, %cst_8 [0] : vector<2x128xf32> to vector<128xf32>
    %17 = vector.shape_cast %16 : vector<128xf32> to vector<1x128xf32>
    %18 = arith.addf %12, %17 : vector<1x128xf32>
    %c0_9 = arith.constant 0 : index
    %c0_10 = arith.constant 0 : index
    %c0_11 = arith.constant 0 : index
    %19 = vector.load %arg4[%c0_9, %c0_10, %c0_11] : memref<1x1x128xf32, #tpu.memory_space<vmem>>, vector<1x1x128xf32>
    %20 = vector.shape_cast %19 : vector<1x1x128xf32> to vector<1x128xf32>
    %21 = vector.shape_cast %18 : vector<1x128xf32> to vector<1x1x128xf32>
    tpu.vector_store %arg4[%c0_9, %c0_10, %c0_11], %21 {strides = array<i32>} : memref<1x1x128xf32, #tpu.memory_space<vmem>>, vector<1x1x128xf32>,
    %c0_12 = arith.constant 0 : index
    %c0_13 = arith.constant 0 : index
    %c0_14 = arith.constant 0 : index
    %22 = vector.load %arg5[%c0_12, %c0_13, %c0_14] : memref<1x1x128xf32, #tpu.memory_space<vmem>>, vector<1x1x128xf32>
    %23 = vector.shape_cast %22 : vector<1x1x128xf32> to vector<1x128xf32>
    %cst_15 = arith.constant dense<0.000000e+00> : vector<128xf32>
    %24 = vector.multi_reduction <add>, %3, %cst_15 [0] : vector<2x128xf32> to vector<128xf32>
    %25 = vector.shape_cast %24 : vector<128xf32> to vector<1x128xf32>
    %26 = arith.addf %23, %25 : vector<1x128xf32>
    %c0_16 = arith.constant 0 : index
    %c0_17 = arith.constant 0 : index
    %c0_18 = arith.constant 0 : index
    %27 = vector.load %arg5[%c0_16, %c0_17, %c0_18] : memref<1x1x128xf32, #tpu.memory_space<vmem>>, vector<1x1x128xf32>
    %28 = vector.shape_cast %27 : vector<1x1x128xf32> to vector<1x128xf32>
    %29 = vector.shape_cast %26 : vector<1x128xf32> to vector<1x1x128xf32>
    tpu.vector_store %arg5[%c0_16, %c0_17, %c0_18], %29 {strides = array<i32>} : memref<1x1x128xf32, #tpu.memory_space<vmem>>, vector<1x1x128xf32>,
    %c0_19 = arith.constant 0 : index
    %c0_20 = arith.constant 0 : index
    %c0_21 = arith.constant 0 : index
    %30 = vector.load %arg6[%c0_19, %c0_20, %c0_21] : memref<1x1x128xf32, #tpu.memory_space<vmem>>, vector<1x1x128xf32>
    %31 = vector.shape_cast %30 : vector<1x1x128xf32> to vector<1x128xf32>
    %cst_22 = arith.constant dense<0.000000e+00> : vector<128xf32>
    %32 = vector.multi_reduction <add>, %4, %cst_22 [0] : vector<2x128xf32> to vector<128xf32>
    %33 = vector.shape_cast %32 : vector<128xf32> to vector<1x128xf32>
    %34 = arith.addf %31, %33 : vector<1x128xf32>
    %c0_23 = arith.constant 0 : index
    %c0_24 = arith.constant 0 : index
    %c0_25 = arith.constant 0 : index
    %35 = vector.load %arg6[%c0_23, %c0_24, %c0_25] : memref<1x1x128xf32, #tpu.memory_space<vmem>>, vector<1x1x128xf32>
    %36 = vector.shape_cast %35 : vector<1x1x128xf32> to vector<1x128xf32>
    %37 = vector.shape_cast %34 : vector<1x128xf32> to vector<1x1x128xf32>
    tpu.vector_store %arg6[%c0_23, %c0_24, %c0_25], %37 {strides = array<i32>} : memref<1x1x128xf32, #tpu.memory_space<vmem>>, vector<1x1x128xf32>,
    return
  }
  func.func @transform_0(%arg0: i32, %arg1: i32) -> (i32, i32) {
    %c1_i32 = arith.constant 1 : i32
    %0 = arith.muli %arg0, %c1_i32 : i32
    %1 = arith.addi %0, %arg1 : i32
    %c0_i32 = arith.constant 0 : i32
    %2 = arith.minsi %1, %c0_i32 : i32
    %c0_i32_0 = arith.constant 0 : i32
    %c0_i32_1 = arith.constant 0 : i32
    return %2, %c0_i32_0 : i32, i32
  }
  func.func @transform_1(%arg0: i32, %arg1: i32) -> (i32, i32) {
    %c1_i32 = arith.constant 1 : i32
    %0 = arith.muli %arg0, %c1_i32 : i32
    %1 = arith.addi %0, %arg1 : i32
    %c0_i32 = arith.constant 0 : i32
    %2 = arith.minsi %1, %c0_i32 : i32
    %c0_i32_0 = arith.constant 0 : i32
    %c0_i32_1 = arith.constant 0 : i32
    return %2, %c0_i32_0 : i32, i32
  }
  func.func @transform_2(%arg0: i32, %arg1: i32) -> (i32, i32, i32) {
    %c0_i32 = arith.constant 0 : i32
    %c0_i32_0 = arith.constant 0 : i32
    %c0_i32_1 = arith.constant 0 : i32
    return %arg0, %c0_i32, %c0_i32_0 : i32, i32, i32
  }
  func.func @transform_3(%arg0: i32, %arg1: i32) -> (i32, i32, i32) {
    %c0_i32 = arith.constant 0 : i32
    %c0_i32_0 = arith.constant 0 : i32
    %c0_i32_1 = arith.constant 0 : i32
    return %arg0, %c0_i32, %c0_i32_0 : i32, i32, i32
  }
  func.func @transform_4(%arg0: i32, %arg1: i32) -> (i32, i32, i32) {
    %c0_i32 = arith.constant 0 : i32
    %c0_i32_0 = arith.constant 0 : i32
    %c0_i32_1 = arith.constant 0 : i32
    return %arg0, %c0_i32, %c0_i32_0 : i32, i32, i32
  }
}

</mosaic_0001>

<bundles_post_ra>
// kernel: tpu_custom_call.1
= control target key start
LH: loop header
LB: loop body
LE: loop exit
PB: predicated region body
PF: predicated region fallthrough
CT: control target
= control target key end

     0   :  { %10 = vsyncpa [#allocation3], 0  ;;  %s349_s0 = inlined_call_operand.hbm [shape: f32[2,128], index: 0, kind: input, shape index: {}]   ;;  %s350_s1 = inlined_call_operand.hbm [shape: f32[2,128], index: 1, kind: input, shape index: {}]   ;;  %s351_s2 = inlined_call_operand.hbm [shape: f32[1,1,128], index: 2, kind: output, shape index: {0}]   ;;  %s352_s3 = inlined_call_operand.hbm [shape: f32[1,1,128], index: 3, kind: output, shape index: {1}]   ;;  %s353_s4 = inlined_call_operand.hbm [shape: f32[1,1,128], index: 4, kind: output, shape index: {2}]  }
   0x1   :  { %11 = vsyncpa [#allocation6], 0 }
   0x2   :  { %12 = vsyncpa [#allocation4], 0 }
   0x3   :  { %13 = vsyncpa [#allocation9], 0  ;;  %s24_s17 = sshll.u32 %s349_s0, 4  ;;  %s300_s18 = smov [#allocation2]   ;;  %s25_s17 = int_to_ptr.hbm [resolvable:$true] %s24_s17 }
   0x4   :  { %s26_s19 = sshll.u32 %s300_s18, 4  ;;  %s40_s22 = sshll.u32 %s350_s1, 4  ;;  %s27_s19 = int_to_ptr.vmem [resolvable:$true] %s26_s19  ;;  %s41_s22 = int_to_ptr.hbm [resolvable:$true] %s40_s22 }
   0x5   :  { %29 = dma.hbm_to_vmem [thread:$0]  %s25_s17, 32, %s27_s19, [#allocation3]  }
   0x6   :  { %s301_s23 = smov [#allocation5]  }
   0x7   :  { %s42_s24 = sshll.u32 %s301_s23, 4  ;;  %s43_s24 = int_to_ptr.vmem [resolvable:$true] %s42_s24 }
   0x8   :  { %45 = dma.hbm_to_vmem [thread:$0]  %s41_s22, 32, %s43_s24, [#allocation6]  }
   0x9   :  { %292 = dma.done.wait [#allocation3], 32  }
   0xa   :  { %293 = vsyncadd [#allocation3], 4294967264 }
   0xb   :  { %294 = dma.done.wait [#allocation6], 32  }
   0xc   :  { %295 = vsyncadd [#allocation6], 4294967264  ;;  %v302_v0 = vmov 0.0   ;;  %vm79_vm0 = vcmask 1041408   ;;  %v67_v1 = vld [vmem:[#allocation2] sm:$0x3] }
   0xd   :  { %65 = vst [vmem:[#allocation8] sm:$0x1] %v302_v0  ;;  %v68_v2 = vld [vmem:[#allocation5] sm:$0x3]  ;;  %v69_v3 = vadd.f32 1e-05, %v67_v1 }
   0xe   :  { %64 = vst [vmem:[#allocation7] sm:$0x1] %v302_v0  ;;  %v90_v4 = vsel %vm79_vm0, %v67_v1, 0.0  ;;  %v100_v5 = vsel %vm79_vm0, %v68_v2, 0.0  ;;  %v72_v7 = vadd.f32 1e-05, %v68_v2 }
   0xf   :  { %66 = vst [vmem:[#allocation10] sm:$0x1] %v302_v0  ;;  %v91_v6 = vrot.slane %v90_v4, 4  ;;  %v101_v8 = vrot.slane %v100_v5, 4  ;;  %168 = vlog2.f32 %v69_v3  ;;  %s303_s0 = smov [#allocation8]   ;;  %s127_s27 = sshll.u32 %s352_s3, 4  ;;  %s128_s27 = int_to_ptr.hbm [resolvable:$true] %s127_s27 }
  0x10   :  { %170 = vlog2.f32 %v72_v7  ;;  %s125_s1 = sshll.u32 %s303_s0, 4  ;;  %s304_s28 = smov [#allocation10]   ;;  %s126_s1 = int_to_ptr.vmem [resolvable:$true] %s125_s1 }
  0x11   :  { %v92_v9 = vadd.f32 %v91_v6, %v90_v4  ;;  %v102_v10 = vadd.f32 %v101_v8, %v100_v5  ;;  %s136_s29 = sshll.u32 %s304_s28, 4  ;;  %s138_s6 = sshll.u32 %s353_s4, 4  ;;  %s137_s29 = int_to_ptr.vmem [resolvable:$true] %s136_s29  ;;  %s139_s6 = int_to_ptr.hbm [resolvable:$true] %s138_s6 }
  0x12   :  { %s305_s3 = smov [#allocation7]   ;;  %s116_s9 = sshll.u32 %s351_s2, 4  ;;  %s117_s9 = int_to_ptr.hbm [resolvable:$true] %s116_s9 }
  0x13   :  { %v93_v11 = vrot.slane %v92_v9, 2  ;;  %v103_v12 = vrot.slane %v102_v10, 2  ;;  %s114_s4 = sshll.u32 %s305_s3, 4  ;;  %s115_s4 = int_to_ptr.vmem [resolvable:$true] %s114_s4 }
  0x14   :  { %v89_v20 = vld [vmem:[#allocation8] sm:$0x1] }
  0x15   :  { %v94_v13 = vadd.f32 %v93_v11, %v92_v9  ;;  %v104_v14 = vadd.f32 %v103_v12, %v102_v10  ;;  %v169_v15 = vpop.eup %168  ;;  %v75_v36 = vld [vmem:[#allocation7] sm:$0x1] }
  0x16   :  { %v171_v16 = vpop.eup %170  ;;  %v71_v18 = vmul.f32 0.6931472, %v169_v15  ;;  %v99_v22 = vld [vmem:[#allocation10] sm:$0x1] }
  0x17   :  { %v95_v17 = vrot.slane %v94_v13, 1  ;;  %v105_v19 = vrot.slane %v104_v14, 1  ;;  %v74_v21 = vmul.f32 0.6931472, %v171_v16 }
  0x18   :  { %v77_v24 = vmul.f32 %v71_v18, %v68_v2 }
  0x19   :  { %v96_v23 = vadd.f32 %v95_v17, %v94_v13  ;;  %v106_v25 = vadd.f32 %v105_v19, %v104_v14  ;;  %v76_v26 = vmul.f32 %v74_v21, %v67_v1 }
  0x1b   :  { %v97_v27 = vadd.f32 %v96_v23, %v89_v20  ;;  %v107_v28 = vadd.f32 %v106_v25, %v99_v22  ;;  %v78_v29 = vadd.f32 %v77_v24, %v76_v26 }
  0x1d   :  { %98 = vst [vmem:[#allocation8] sm:$0x1] %v97_v27  ;;  %v80_v30 = vsel %vm79_vm0, %v78_v29, 0.0 }
  0x1e   :  { %108 = vst [vmem:[#allocation10] sm:$0x1] %v107_v28  ;;  %130 = dma.vmem_to_hbm [thread:$0]  %s126_s1, 16, %s128_s27, [#allocation9]   ;;  %v81_v31 = vrot.slane %v80_v30, 4 }
  0x1f   :  { %141 = dma.vmem_to_hbm [thread:$0]  %s137_s29, 16, %s139_s6, [#allocation9]  }
  0x20   :  { %v82_v32 = vadd.f32 %v81_v31, %v80_v30 }
  0x22   :  { %v83_v33 = vrot.slane %v82_v32, 2 }
  0x24   :  { %v84_v34 = vadd.f32 %v83_v33, %v82_v32 }
  0x26   :  { %v85_v35 = vrot.slane %v84_v34, 1 }
  0x28   :  { %v86_v37 = vadd.f32 %v85_v35, %v84_v34 }
  0x2a   :  { %v87_v38 = vadd.f32 %v86_v37, %v75_v36 }
  0x2c   :  { %88 = vst [vmem:[#allocation7] sm:$0x1] %v87_v38 }
  0x2d   :  { %119 = dma.vmem_to_hbm [thread:$0]  %s115_s4, 16, %s117_s9, [#allocation4]  }
  0x2e   :  { %296 = dma.done.wait [#allocation4], 16  }
  0x2f   :  { %297 = vsyncadd [#allocation4], 4294967280 }
  0x30   :  { %298 = dma.done.wait [#allocation9], 32  }
  0x31   :  { %299 = vsyncadd [#allocation9], 4294967264 }
  0x32   :  { %154 = vsyncpa [#allocation3], 1 }
  0x33   :  { %155 = vsyncpa [#allocation6], 1 }
  0x34   :  { %156 = vsyncpa [#allocation4], 1 }
  0x35   :  { %157 = vsyncpa [#allocation9], 1 }

</bundles_post_ra>
